<compile_context>
chip_gen: v5e
topology: v5e:2x2
jax: 0.10.0
libtpu: 0.0.40
codegen_flags: <defaults>
</compile_context>

<pallas_src>
import jax
import jax.numpy as jnp
from jax.experimental import pallas as pl
from jax.experimental.pallas import tpu as pltpu


def _make_dwconv_kernel(C, K, H, W, pad):
    """Kernel closed over static channel count / kernel size / spatial extent."""
    Hp, Wp = H + 2 * pad, W + 2 * pad
    Ho, Wo = Hp - K + 1, Wp - K + 1

    def dwconv_kernel(x_ref, w_ref, o_ref, xp_ref):
        # x_ref : VMEM block (1, C, H, W)   -- unpadded input for batch n
        # w_ref : SMEM full  (C*K*K,)       -- flattened depthwise filters
        # o_ref : VMEM block (1, C, Ho, Wo)
        # xp_ref: VMEM scratch (C, Hp, Wp)  -- in-kernel zero-padded copy

        # In-kernel padding: memset the scratch, copy the interior.
        # (Zero every step: scratch is per-core on megacore parts, so gating
        #  the memset on program_id(0) == 0 would be unsafe on v7x.)
        xp_ref[...] = jnp.zeros_like(xp_ref)
        if pad > 0:
            xp_ref[:, pad:pad + H, pad:pad + W] = x_ref[0]
        else:
            xp_ref[...] = x_ref[0]

        # Hot path: per-channel K*K shifted multiply-accumulates on the VPU.
        # Tap windows are read as shifted views of the VMEM scratch ref; the
        # per-tap weight is a scalar SMEM read broadcast by the VALU.
        for c in range(C):
            acc = jnp.zeros((Ho, Wo), jnp.float32)
            for kh in range(K):
                for kw in range(K):
                    wk = w_ref[c * K * K + kh * K + kw]
                    win = xp_ref[c, kh:kh + Ho, kw:kw + Wo].astype(jnp.float32)
                    acc = acc + wk * win
            o_ref[0, c] = acc.astype(o_ref.dtype)

    return dwconv_kernel


def depthwise_conv2d(x, w, padding=0):
    """Depthwise conv2d (stride=1, dilation=1, bias=False).

    x : (N, C, H, W)   float32
    w : (C, 1, K, K)   float32   (PyTorch depthwise weight layout)
    """
    N, C, H, W = x.shape
    K = w.shape[-1]
    p = padding
    Hp, Wp = H + 2 * p, W + 2 * p
    Ho, Wo = Hp - K + 1, Wp - K + 1

    # Flat 1-D SMEM weight table (avoids multi-dim SMEM (8,128)-word padding).
    w_flat = w.reshape(C * K * K).astype(jnp.float32)

    kernel = _make_dwconv_kernel(C, K, H, W, p)

    out = pl.pallas_call(
        kernel,
        out_shape=jax.ShapeDtypeStruct((N, C, Ho, Wo), x.dtype),
        grid=(N,),
        in_specs=[
            pl.BlockSpec((1, C, H, W), lambda n: (n, 0, 0, 0)),
            pl.BlockSpec(memory_space=pltpu.MemorySpace.SMEM),
        ],
        out_specs=pl.BlockSpec((1, C, Ho, Wo), lambda n: (n, 0, 0, 0)),
        scratch_shapes=[pltpu.VMEM((C, Hp, Wp), jnp.float32)],
        compiler_params=pltpu.CompilerParams(
            dimension_semantics=("parallel",)),
    )(x, w_flat)
    return out


def depthwise_conv2d_ref(x, w, padding=0):
    """Pure-JAX reference (lax conv with feature_group_count = C)."""
    C = x.shape[1]
    return jax.lax.conv_general_dilated(
        x, w,
        window_strides=(1, 1),
        padding=[(padding, padding), (padding, padding)],
        dimension_numbers=("NCHW", "OIHW", "NCHW"),
        feature_group_count=C,
    )


if __name__ == "__main__":
    # Module config: DepthwiseConv2d(in_ch=4, k=3, padding=1, bias=False)
    N, C, H, W = 2, 4, 16, 16
    K, PAD = 3, 1

    key = jax.random.PRNGKey(0)
    kx, kw = jax.random.split(key)
    x = jax.random.normal(kx, (N, C, H, W), dtype=jnp.float32)
    # PyTorch depthwise Conv2d weight shape: (in_ch, 1, K, K); deterministic init.
    fan_in = 1 * K * K
    bound = 1.0 / (fan_in ** 0.5)
    w = jax.random.uniform(kw, (C, 1, K, K), minval=-bound, maxval=bound,
                           dtype=jnp.float32)

    y = depthwise_conv2d(x, w, padding=PAD)
    y = jax.block_until_ready(y)

    y_ref = depthwise_conv2d_ref(x, w, padding=PAD)
    assert y.shape == y_ref.shape, (y.shape, y_ref.shape)
    assert jnp.allclose(y, y_ref, atol=1e-5, rtol=1e-5), "mismatch vs reference"

    print("KERNEL_OK")
</pallas_src>

<mosaic_0001>
module attributes {stable_mosaic.version = 11 : i64} {
  func.func @dwconv_kernel(%arg0: i32, %arg1: memref<1x4x16x16xf32, #tpu.memory_space<vmem>>, %arg2: memref<36xf32, #tpu.memory_space<smem>>, %arg3: memref<1x4x16x16xf32, #tpu.memory_space<vmem>>, %arg4: memref<4x18x18xf32, #tpu.memory_space<vmem>>) attributes {dimension_semantics = [#tpu.dimension_semantics<parallel>], iteration_bounds = array<i64: 2>, scalar_prefetch = 0 : i64, scratch_operands = 1 : i64, tpu.core_type = #tpu.core_type<tc>, window_params = [{transform_indices = @transform_0, window_bounds = array<i64: 1, 4, 16, 16>}, {transform_indices = @transform_1, window_bounds = array<i64: 36>}, {transform_indices = @transform_2, window_bounds = array<i64: 1, 4, 16, 16>}]} {
    %cst = arith.constant 0.000000e+00 : f32
    %0 = vector.broadcast %cst : f32 to vector<4x18x18xf32>
    %c0 = arith.constant 0 : index
    %c0_0 = arith.constant 0 : index
    %c0_1 = arith.constant 0 : index
    %1 = vector.load %arg4[%c0, %c0_0, %c0_1] : memref<4x18x18xf32, #tpu.memory_space<vmem>>, vector<4x18x18xf32>
    tpu.vector_store %arg4[%c0, %c0_0, %c0_1], %0 {strides = array<i32>} : memref<4x18x18xf32, #tpu.memory_space<vmem>>, vector<4x18x18xf32>,
    %c0_2 = arith.constant 0 : index
    %c0_3 = arith.constant 0 : index
    %c0_4 = arith.constant 0 : index
    %c0_5 = arith.constant 0 : index
    %2 = vector.load %arg1[%c0_2, %c0_3, %c0_4, %c0_5] : memref<1x4x16x16xf32, #tpu.memory_space<vmem>>, vector<1x4x16x16xf32>
    %3 = vector.shape_cast %2 : vector<1x4x16x16xf32> to vector<4x16x16xf32>
    %c0_6 = arith.constant 0 : index
    %c1 = arith.constant 1 : index
    %c1_7 = arith.constant 1 : index
    %4 = vector.load %arg4[%c0_6, %c1, %c1_7] : memref<4x18x18xf32, #tpu.memory_space<vmem>>, vector<4x16x16xf32>
    tpu.vector_store %arg4[%c0_6, %c1, %c1_7], %3 {strides = array<i32>} : memref<4x18x18xf32, #tpu.memory_space<vmem>>, vector<4x16x16xf32>,
    %cst_8 = arith.constant 0.000000e+00 : f32
    %5 = vector.broadcast %cst_8 : f32 to vector<16x16xf32>
    %c0_9 = arith.constant 0 : index
    %6 = memref.load %arg2[%c0_9] : memref<36xf32, #tpu.memory_space<smem>>
    %c0_10 = arith.constant 0 : index
    %c0_11 = arith.constant 0 : index
    %c0_12 = arith.constant 0 : index
    %7 = vector.load %arg4[%c0_10, %c0_11, %c0_12] : memref<4x18x18xf32, #tpu.memory_space<vmem>>, vector<1x16x16xf32>
    %8 = vector.shape_cast %7 : vector<1x16x16xf32> to vector<16x16xf32>
    %9 = vector.broadcast %6 : f32 to vector<16x16xf32>
    %10 = arith.mulf %9, %8 : vector<16x16xf32>
    %11 = arith.addf %5, %10 : vector<16x16xf32>
    %c1_13 = arith.constant 1 : index
    %12 = memref.load %arg2[%c1_13] : memref<36xf32, #tpu.memory_space<smem>>
    %c0_14 = arith.constant 0 : index
    %c0_15 = arith.constant 0 : index
    %c1_16 = arith.constant 1 : index
    %13 = vector.load %arg4[%c0_14, %c0_15, %c1_16] : memref<4x18x18xf32, #tpu.memory_space<vmem>>, vector<1x16x16xf32>
    %14 = vector.shape_cast %13 : vector<1x16x16xf32> to vector<16x16xf32>
    %15 = vector.broadcast %12 : f32 to vector<16x16xf32>
    %16 = arith.mulf %15, %14 : vector<16x16xf32>
    %17 = arith.addf %11, %16 : vector<16x16xf32>
    %c2 = arith.constant 2 : index
    %18 = memref.load %arg2[%c2] : memref<36xf32, #tpu.memory_space<smem>>
    %c0_17 = arith.constant 0 : index
    %c0_18 = arith.constant 0 : index
    %c2_19 = arith.constant 2 : index
    %19 = vector.load %arg4[%c0_17, %c0_18, %c2_19] : memref<4x18x18xf32, #tpu.memory_space<vmem>>, vector<1x16x16xf32>
    %20 = vector.shape_cast %19 : vector<1x16x16xf32> to vector<16x16xf32>
    %21 = vector.broadcast %18 : f32 to vector<16x16xf32>
    %22 = arith.mulf %21, %20 : vector<16x16xf32>
    %23 = arith.addf %17, %22 : vector<16x16xf32>
    %c3 = arith.constant 3 : index
    %24 = memref.load %arg2[%c3] : memref<36xf32, #tpu.memory_space<smem>>
    %c0_20 = arith.constant 0 : index
    %c1_21 = arith.constant 1 : index
    %c0_22 = arith.constant 0 : index
    %25 = vector.load %arg4[%c0_20, %c1_21, %c0_22] : memref<4x18x18xf32, #tpu.memory_space<vmem>>, vector<1x16x16xf32>
    %26 = vector.shape_cast %25 : vector<1x16x16xf32> to vector<16x16xf32>
    %27 = vector.broadcast %24 : f32 to vector<16x16xf32>
    %28 = arith.mulf %27, %26 : vector<16x16xf32>
    %29 = arith.addf %23, %28 : vector<16x16xf32>
    %c4 = arith.constant 4 : index
    %30 = memref.load %arg2[%c4] : memref<36xf32, #tpu.memory_space<smem>>
    %c0_23 = arith.constant 0 : index
    %c1_24 = arith.constant 1 : index
    %c1_25 = arith.constant 1 : index
    %31 = vector.load %arg4[%c0_23, %c1_24, %c1_25] : memref<4x18x18xf32, #tpu.memory_space<vmem>>, vector<1x16x16xf32>
    %32 = vector.shape_cast %31 : vector<1x16x16xf32> to vector<16x16xf32>
    %33 = vector.broadcast %30 : f32 to vector<16x16xf32>
    %34 = arith.mulf %33, %32 : vector<16x16xf32>
    %35 = arith.addf %29, %34 : vector<16x16xf32>
    %c5 = arith.constant 5 : index
    %36 = memref.load %arg2[%c5] : memref<36xf32, #tpu.memory_space<smem>>
    %c0_26 = arith.constant 0 : index
    %c1_27 = arith.constant 1 : index
    %c2_28 = arith.constant 2 : index
    %37 = vector.load %arg4[%c0_26, %c1_27, %c2_28] : memref<4x18x18xf32, #tpu.memory_space<vmem>>, vector<1x16x16xf32>
    %38 = vector.shape_cast %37 : vector<1x16x16xf32> to vector<16x16xf32>
    %39 = vector.broadcast %36 : f32 to vector<16x16xf32>
    %40 = arith.mulf %39, %38 : vector<16x16xf32>
    %41 = arith.addf %35, %40 : vector<16x16xf32>
    %c6 = arith.constant 6 : index
    %42 = memref.load %arg2[%c6] : memref<36xf32, #tpu.memory_space<smem>>
    %c0_29 = arith.constant 0 : index
    %c2_30 = arith.constant 2 : index
    %c0_31 = arith.constant 0 : index
    %43 = vector.load %arg4[%c0_29, %c2_30, %c0_31] : memref<4x18x18xf32, #tpu.memory_space<vmem>>, vector<1x16x16xf32>
    %44 = vector.shape_cast %43 : vector<1x16x16xf32> to vector<16x16xf32>
    %45 = vector.broadcast %42 : f32 to vector<16x16xf32>
    %46 = arith.mulf %45, %44 : vector<16x16xf32>
    %47 = arith.addf %41, %46 : vector<16x16xf32>
    %c7 = arith.constant 7 : index
    %48 = memref.load %arg2[%c7] : memref<36xf32, #tpu.memory_space<smem>>
    %c0_32 = arith.constant 0 : index
    %c2_33 = arith.constant 2 : index
    %c1_34 = arith.constant 1 : index
    %49 = vector.load %arg4[%c0_32, %c2_33, %c1_34] : memref<4x18x18xf32, #tpu.memory_space<vmem>>, vector<1x16x16xf32>
    %50 = vector.shape_cast %49 : vector<1x16x16xf32> to vector<16x16xf32>
    %51 = vector.broadcast %48 : f32 to vector<16x16xf32>
    %52 = arith.mulf %51, %50 : vector<16x16xf32>
    %53 = arith.addf %47, %52 : vector<16x16xf32>
    %c8 = arith.constant 8 : index
    %54 = memref.load %arg2[%c8] : memref<36xf32, #tpu.memory_space<smem>>
    %c0_35 = arith.constant 0 : index
    %c2_36 = arith.constant 2 : index
    %c2_37 = arith.constant 2 : index
    %55 = vector.load %arg4[%c0_35, %c2_36, %c2_37] : memref<4x18x18xf32, #tpu.memory_space<vmem>>, vector<1x16x16xf32>
    %56 = vector.shape_cast %55 : vector<1x16x16xf32> to vector<16x16xf32>
    %57 = vector.broadcast %54 : f32 to vector<16x16xf32>
    %58 = arith.mulf %57, %56 : vector<16x16xf32>
    %59 = arith.addf %53, %58 : vector<16x16xf32>
    %c0_38 = arith.constant 0 : index
    %c0_39 = arith.constant 0 : index
    %c0_40 = arith.constant 0 : index
    %c0_41 = arith.constant 0 : index
    %60 = vector.load %arg3[%c0_38, %c0_39, %c0_40, %c0_41] : memref<1x4x16x16xf32, #tpu.memory_space<vmem>>, vector<1x1x16x16xf32>
    %61 = vector.shape_cast %60 : vector<1x1x16x16xf32> to vector<16x16xf32>
    %62 = vector.shape_cast %59 : vector<16x16xf32> to vector<1x1x16x16xf32>
    tpu.vector_store %arg3[%c0_38, %c0_39, %c0_40, %c0_41], %62 {strides = array<i32>} : memref<1x4x16x16xf32, #tpu.memory_space<vmem>>, vector<1x1x16x16xf32>,
    %cst_42 = arith.constant 0.000000e+00 : f32
    %63 = vector.broadcast %cst_42 : f32 to vector<16x16xf32>
    %c9 = arith.constant 9 : index
    %64 = memref.load %arg2[%c9] : memref<36xf32, #tpu.memory_space<smem>>
    %c1_43 = arith.constant 1 : index
    %c0_44 = arith.constant 0 : index
    %c0_45 = arith.constant 0 : index
    %65 = vector.load %arg4[%c1_43, %c0_44, %c0_45] : memref<4x18x18xf32, #tpu.memory_space<vmem>>, vector<1x16x16xf32>
    %66 = vector.shape_cast %65 : vector<1x16x16xf32> to vector<16x16xf32>
    %67 = vector.broadcast %64 : f32 to vector<16x16xf32>
    %68 = arith.mulf %67, %66 : vector<16x16xf32>
    %69 = arith.addf %63, %68 : vector<16x16xf32>
    %c10 = arith.constant 10 : index
    %70 = memref.load %arg2[%c10] : memref<36xf32, #tpu.memory_space<smem>>
    %c1_46 = arith.constant 1 : index
    %c0_47 = arith.constant 0 : index
    %c1_48 = arith.constant 1 : index
    %71 = vector.load %arg4[%c1_46, %c0_47, %c1_48] : memref<4x18x18xf32, #tpu.memory_space<vmem>>, vector<1x16x16xf32>
    %72 = vector.shape_cast %71 : vector<1x16x16xf32> to vector<16x16xf32>
    %73 = vector.broadcast %70 : f32 to vector<16x16xf32>
    %74 = arith.mulf %73, %72 : vector<16x16xf32>
    %75 = arith.addf %69, %74 : vector<16x16xf32>
    %c11 = arith.constant 11 : index
    %76 = memref.load %arg2[%c11] : memref<36xf32, #tpu.memory_space<smem>>
    %c1_49 = arith.constant 1 : index
    %c0_50 = arith.constant 0 : index
    %c2_51 = arith.constant 2 : index
    %77 = vector.load %arg4[%c1_49, %c0_50, %c2_51] : memref<4x18x18xf32, #tpu.memory_space<vmem>>, vector<1x16x16xf32>
    %78 = vector.shape_cast %77 : vector<1x16x16xf32> to vector<16x16xf32>
    %79 = vector.broadcast %76 : f32 to vector<16x16xf32>
    %80 = arith.mulf %79, %78 : vector<16x16xf32>
    %81 = arith.addf %75, %80 : vector<16x16xf32>
    %c12 = arith.constant 12 : index
    %82 = memref.load %arg2[%c12] : memref<36xf32, #tpu.memory_space<smem>>
    %c1_52 = arith.constant 1 : index
    %c1_53 = arith.constant 1 : index
    %c0_54 = arith.constant 0 : index
    %83 = vector.load %arg4[%c1_52, %c1_53, %c0_54] : memref<4x18x18xf32, #tpu.memory_space<vmem>>, vector<1x16x16xf32>
    %84 = vector.shape_cast %83 : vector<1x16x16xf32> to vector<16x16xf32>
    %85 = vector.broadcast %82 : f32 to vector<16x16xf32>
    %86 = arith.mulf %85, %84 : vector<16x16xf32>
    %87 = arith.addf %81, %86 : vector<16x16xf32>
    %c13 = arith.constant 13 : index
    %88 = memref.load %arg2[%c13] : memref<36xf32, #tpu.memory_space<smem>>
    %c1_55 = arith.constant 1 : index
    %c1_56 = arith.constant 1 : index
    %c1_57 = arith.constant 1 : index
    %89 = vector.load %arg4[%c1_55, %c1_56, %c1_57] : memref<4x18x18xf32, #tpu.memory_space<vmem>>, vector<1x16x16xf32>
    %90 = vector.shape_cast %89 : vector<1x16x16xf32> to vector<16x16xf32>
    %91 = vector.broadcast %88 : f32 to vector<16x16xf32>
    %92 = arith.mulf %91, %90 : vector<16x16xf32>
    %93 = arith.addf %87, %92 : vector<16x16xf32>
    %c14 = arith.constant 14 : index
    %94 = memref.load %arg2[%c14] : memref<36xf32, #tpu.memory_space<smem>>
    %c1_58 = arith.constant 1 : index
    %c1_59 = arith.constant 1 : index
    %c2_60 = arith.constant 2 : index
    %95 = vector.load %arg4[%c1_58, %c1_59, %c2_60] : memref<4x18x18xf32, #tpu.memory_space<vmem>>, vector<1x16x16xf32>
    %96 = vector.shape_cast %95 : vector<1x16x16xf32> to vector<16x16xf32>
    %97 = vector.broadcast %94 : f32 to vector<16x16xf32>
    %98 = arith.mulf %97, %96 : vector<16x16xf32>
    %99 = arith.addf %93, %98 : vector<16x16xf32>
    %c15 = arith.constant 15 : index
    %100 = memref.load %arg2[%c15] : memref<36xf32, #tpu.memory_space<smem>>
    %c1_61 = arith.constant 1 : index
    %c2_62 = arith.constant 2 : index
    %c0_63 = arith.constant 0 : index
    %101 = vector.load %arg4[%c1_61, %c2_62, %c0_63] : memref<4x18x18xf32, #tpu.memory_space<vmem>>, vector<1x16x16xf32>
    %102 = vector.shape_cast %101 : vector<1x16x16xf32> to vector<16x16xf32>
    %103 = vector.broadcast %100 : f32 to vector<16x16xf32>
    %104 = arith.mulf %103, %102 : vector<16x16xf32>
    %105 = arith.addf %99, %104 : vector<16x16xf32>
    %c16 = arith.constant 16 : index
    %106 = memref.load %arg2[%c16] : memref<36xf32, #tpu.memory_space<smem>>
    %c1_64 = arith.constant 1 : index
    %c2_65 = arith.constant 2 : index
    %c1_66 = arith.constant 1 : index
    %107 = vector.load %arg4[%c1_64, %c2_65, %c1_66] : memref<4x18x18xf32, #tpu.memory_space<vmem>>, vector<1x16x16xf32>
    %108 = vector.shape_cast %107 : vector<1x16x16xf32> to vector<16x16xf32>
    %109 = vector.broadcast %106 : f32 to vector<16x16xf32>
    %110 = arith.mulf %109, %108 : vector<16x16xf32>
    %111 = arith.addf %105, %110 : vector<16x16xf32>
    %c17 = arith.constant 17 : index
    %112 = memref.load %arg2[%c17] : memref<36xf32, #tpu.memory_space<smem>>
    %c1_67 = arith.constant 1 : index
    %c2_68 = arith.constant 2 : index
    %c2_69 = arith.constant 2 : index
    %113 = vector.load %arg4[%c1_67, %c2_68, %c2_69] : memref<4x18x18xf32, #tpu.memory_space<vmem>>, vector<1x16x16xf32>
    %114 = vector.shape_cast %113 : vector<1x16x16xf32> to vector<16x16xf32>
    %115 = vector.broadcast %112 : f32 to vector<16x16xf32>
    %116 = arith.mulf %115, %114 : vector<16x16xf32>
    %117 = arith.addf %111, %116 : vector<16x16xf32>
    %c0_70 = arith.constant 0 : index
    %c1_71 = arith.constant 1 : index
    %c0_72 = arith.constant 0 : index
    %c0_73 = arith.constant 0 : index
    %118 = vector.load %arg3[%c0_70, %c1_71, %c0_72, %c0_73] : memref<1x4x16x16xf32, #tpu.memory_space<vmem>>, vector<1x1x16x16xf32>
    %119 = vector.shape_cast %118 : vector<1x1x16x16xf32> to vector<16x16xf32>
    %120 = vector.shape_cast %117 : vector<16x16xf32> to vector<1x1x16x16xf32>
    tpu.vector_store %arg3[%c0_70, %c1_71, %c0_72, %c0_73], %120 {strides = array<i32>} : memref<1x4x16x16xf32, #tpu.memory_space<vmem>>, vector<1x1x16x16xf32>,
    %cst_74 = arith.constant 0.000000e+00 : f32
    %121 = vector.broadcast %cst_74 : f32 to vector<16x16xf32>
    %c18 = arith.constant 18 : index
    %122 = memref.load %arg2[%c18] : memref<36xf32, #tpu.memory_space<smem>>
    %c2_75 = arith.constant 2 : index
    %c0_76 = arith.constant 0 : index
    %c0_77 = arith.constant 0 : index
    %123 = vector.load %arg4[%c2_75, %c0_76, %c0_77] : memref<4x18x18xf32, #tpu.memory_space<vmem>>, vector<1x16x16xf32>
    %124 = vector.shape_cast %123 : vector<1x16x16xf32> to vector<16x16xf32>
    %125 = vector.broadcast %122 : f32 to vector<16x16xf32>
    %126 = arith.mulf %125, %124 : vector<16x16xf32>
    %127 = arith.addf %121, %126 : vector<16x16xf32>
    %c19 = arith.constant 19 : index
    %128 = memref.load %arg2[%c19] : memref<36xf32, #tpu.memory_space<smem>>
    %c2_78 = arith.constant 2 : index
    %c0_79 = arith.constant 0 : index
    %c1_80 = arith.constant 1 : index
    %129 = vector.load %arg4[%c2_78, %c0_79, %c1_80] : memref<4x18x18xf32, #tpu.memory_space<vmem>>, vector<1x16x16xf32>
    %130 = vector.shape_cast %129 : vector<1x16x16xf32> to vector<16x16xf32>
    %131 = vector.broadcast %128 : f32 to vector<16x16xf32>
    %132 = arith.mulf %131, %130 : vector<16x16xf32>
    %133 = arith.addf %127, %132 : vector<16x16xf32>
    %c20 = arith.constant 20 : index
    %134 = memref.load %arg2[%c20] : memref<36xf32, #tpu.memory_space<smem>>
    %c2_81 = arith.constant 2 : index
    %c0_82 = arith.constant 0 : index
    %c2_83 = arith.constant 2 : index
    %135 = vector.load %arg4[%c2_81, %c0_82, %c2_83] : memref<4x18x18xf32, #tpu.memory_space<vmem>>, vector<1x16x16xf32>
    %136 = vector.shape_cast %135 : vector<1x16x16xf32> to vector<16x16xf32>
    %137 = vector.broadcast %134 : f32 to vector<16x16xf32>
    %138 = arith.mulf %137, %136 : vector<16x16xf32>
    %139 = arith.addf %133, %138 : vector<16x16xf32>
    %c21 = arith.constant 21 : index
    %140 = memref.load %arg2[%c21] : memref<36xf32, #tpu.memory_space<smem>>
    %c2_84 = arith.constant 2 : index
    %c1_85 = arith.constant 1 : index
    %c0_86 = arith.constant 0 : index
    %141 = vector.load %arg4[%c2_84, %c1_85, %c0_86] : memref<4x18x18xf32, #tpu.memory_space<vmem>>, vector<1x16x16xf32>
    %142 = vector.shape_cast %141 : vector<1x16x16xf32> to vector<16x16xf32>
    %143 = vector.broadcast %140 : f32 to vector<16x16xf32>
    %144 = arith.mulf %143, %142 : vector<16x16xf32>
    %145 = arith.addf %139, %144 : vector<16x16xf32>
    %c22 = arith.constant 22 : index
    %146 = memref.load %arg2[%c22] : memref<36xf32, #tpu.memory_space<smem>>
    %c2_87 = arith.constant 2 : index
    %c1_88 = arith.constant 1 : index
    %c1_89 = arith.constant 1 : index
    %147 = vector.load %arg4[%c2_87, %c1_88, %c1_89] : memref<4x18x18xf32, #tpu.memory_space<vmem>>, vector<1x16x16xf32>
    %148 = vector.shape_cast %147 : vector<1x16x16xf32> to vector<16x16xf32>
    %149 = vector.broadcast %146 : f32 to vector<16x16xf32>
    %150 = arith.mulf %149, %148 : vector<16x16xf32>
    %151 = arith.addf %145, %150 : vector<16x16xf32>
    %c23 = arith.constant 23 : index
    %152 = memref.load %arg2[%c23] : memref<36xf32, #tpu.memory_space<smem>>
    %c2_90 = arith.constant 2 : index
    %c1_91 = arith.constant 1 : index
    %c2_92 = arith.constant 2 : index
    %153 = vector.load %arg4[%c2_90, %c1_91, %c2_92] : memref<4x18x18xf32, #tpu.memory_space<vmem>>, vector<1x16x16xf32>
    %154 = vector.shape_cast %153 : vector<1x16x16xf32> to vector<16x16xf32>
    %155 = vector.broadcast %152 : f32 to vector<16x16xf32>
    %156 = arith.mulf %155, %154 : vector<16x16xf32>
    %157 = arith.addf %151, %156 : vector<16x16xf32>
    %c24 = arith.constant 24 : index
    %158 = memref.load %arg2[%c24] : memref<36xf32, #tpu.memory_space<smem>>
    %c2_93 = arith.constant 2 : index
    %c2_94 = arith.constant 2 : index
    %c0_95 = arith.constant 0 : index
    %159 = vector.load %arg4[%c2_93, %c2_94, %c0_95] : memref<4x18x18xf32, #tpu.memory_space<vmem>>, vector<1x16x16xf32>
    %160 = vector.shape_cast %159 : vector<1x16x16xf32> to vector<16x16xf32>
    %161 = vector.broadcast %158 : f32 to vector<16x16xf32>
    %162 = arith.mulf %161, %160 : vector<16x16xf32>
    %163 = arith.addf %157, %162 : vector<16x16xf32>
    %c25 = arith.constant 25 : index
    %164 = memref.load %arg2[%c25] : memref<36xf32, #tpu.memory_space<smem>>
    %c2_96 = arith.constant 2 : index
    %c2_97 = arith.constant 2 : index
    %c1_98 = arith.constant 1 : index
    %165 = vector.load %arg4[%c2_96, %c2_97, %c1_98] : memref<4x18x18xf32, #tpu.memory_space<vmem>>, vector<1x16x16xf32>
    %166 = vector.shape_cast %165 : vector<1x16x16xf32> to vector<16x16xf32>
    %167 = vector.broadcast %164 : f32 to vector<16x16xf32>
    %168 = arith.mulf %167, %166 : vector<16x16xf32>
    %169 = arith.addf %163, %168 : vector<16x16xf32>
    %c26 = arith.constant 26 : index
    %170 = memref.load %arg2[%c26] : memref<36xf32, #tpu.memory_space<smem>>
    %c2_99 = arith.constant 2 : index
    %c2_100 = arith.constant 2 : index
    %c2_101 = arith.constant 2 : index
    %171 = vector.load %arg4[%c2_99, %c2_100, %c2_101] : memref<4x18x18xf32, #tpu.memory_space<vmem>>, vector<1x16x16xf32>
    %172 = vector.shape_cast %171 : vector<1x16x16xf32> to vector<16x16xf32>
    %173 = vector.broadcast %170 : f32 to vector<16x16xf32>
    %174 = arith.mulf %173, %172 : vector<16x16xf32>
    %175 = arith.addf %169, %174 : vector<16x16xf32>
    %c0_102 = arith.constant 0 : index
    %c2_103 = arith.constant 2 : index
    %c0_104 = arith.constant 0 : index
    %c0_105 = arith.constant 0 : index
    %176 = vector.load %arg3[%c0_102, %c2_103, %c0_104, %c0_105] : memref<1x4x16x16xf32, #tpu.memory_space<vmem>>, vector<1x1x16x16xf32>
    %177 = vector.shape_cast %176 : vector<1x1x16x16xf32> to vector<16x16xf32>
    %178 = vector.shape_cast %175 : vector<16x16xf32> to vector<1x1x16x16xf32>
    tpu.vector_store %arg3[%c0_102, %c2_103, %c0_104, %c0_105], %178 {strides = array<i32>} : memref<1x4x16x16xf32, #tpu.memory_space<vmem>>, vector<1x1x16x16xf32>,
    %cst_106 = arith.constant 0.000000e+00 : f32
    %179 = vector.broadcast %cst_106 : f32 to vector<16x16xf32>
    %c27 = arith.constant 27 : index
    %180 = memref.load %arg2[%c27] : memref<36xf32, #tpu.memory_space<smem>>
    %c3_107 = arith.constant 3 : index
    %c0_108 = arith.constant 0 : index
    %c0_109 = arith.constant 0 : index
    %181 = vector.load %arg4[%c3_107, %c0_108, %c0_109] : memref<4x18x18xf32, #tpu.memory_space<vmem>>, vector<1x16x16xf32>
    %182 = vector.shape_cast %181 : vector<1x16x16xf32> to vector<16x16xf32>
    %183 = vector.broadcast %180 : f32 to vector<16x16xf32>
    %184 = arith.mulf %183, %182 : vector<16x16xf32>
    %185 = arith.addf %179, %184 : vector<16x16xf32>
    %c28 = arith.constant 28 : index
    %186 = memref.load %arg2[%c28] : memref<36xf32, #tpu.memory_space<smem>>
    %c3_110 = arith.constant 3 : index
    %c0_111 = arith.constant 0 : index
    %c1_112 = arith.constant 1 : index
    %187 = vector.load %arg4[%c3_110, %c0_111, %c1_112] : memref<4x18x18xf32, #tpu.memory_space<vmem>>, vector<1x16x16xf32>
    %188 = vector.shape_cast %187 : vector<1x16x16xf32> to vector<16x16xf32>
    %189 = vector.broadcast %186 : f32 to vector<16x16xf32>
    %190 = arith.mulf %189, %188 : vector<16x16xf32>
    %191 = arith.addf %185, %190 : vector<16x16xf32>
    %c29 = arith.constant 29 : index
    %192 = memref.load %arg2[%c29] : memref<36xf32, #tpu.memory_space<smem>>
    %c3_113 = arith.constant 3 : index
    %c0_114 = arith.constant 0 : index
    %c2_115 = arith.constant 2 : index
    %193 = vector.load %arg4[%c3_113, %c0_114, %c2_115] : memref<4x18x18xf32, #tpu.memory_space<vmem>>, vector<1x16x16xf32>
    %194 = vector.shape_cast %193 : vector<1x16x16xf32> to vector<16x16xf32>
    %195 = vector.broadcast %192 : f32 to vector<16x16xf32>
    %196 = arith.mulf %195, %194 : vector<16x16xf32>
    %197 = arith.addf %191, %196 : vector<16x16xf32>
    %c30 = arith.constant 30 : index
    %198 = memref.load %arg2[%c30] : memref<36xf32, #tpu.memory_space<smem>>
    %c3_116 = arith.constant 3 : index
    %c1_117 = arith.constant 1 : index
    %c0_118 = arith.constant 0 : index
    %199 = vector.load %arg4[%c3_116, %c1_117, %c0_118] : memref<4x18x18xf32, #tpu.memory_space<vmem>>, vector<1x16x16xf32>
    %200 = vector.shape_cast %199 : vector<1x16x16xf32> to vector<16x16xf32>
    %201 = vector.broadcast %198 : f32 to vector<16x16xf32>
    %202 = arith.mulf %201, %200 : vector<16x16xf32>
    %203 = arith.addf %197, %202 : vector<16x16xf32>
    %c31 = arith.constant 31 : index
    %204 = memref.load %arg2[%c31] : memref<36xf32, #tpu.memory_space<smem>>
    %c3_119 = arith.constant 3 : index
    %c1_120 = arith.constant 1 : index
    %c1_121 = arith.constant 1 : index
    %205 = vector.load %arg4[%c3_119, %c1_120, %c1_121] : memref<4x18x18xf32, #tpu.memory_space<vmem>>, vector<1x16x16xf32>
    %206 = vector.shape_cast %205 : vector<1x16x16xf32> to vector<16x16xf32>
    %207 = vector.broadcast %204 : f32 to vector<16x16xf32>
    %208 = arith.mulf %207, %206 : vector<16x16xf32>
    %209 = arith.addf %203, %208 : vector<16x16xf32>
    %c32 = arith.constant 32 : index
    %210 = memref.load %arg2[%c32] : memref<36xf32, #tpu.memory_space<smem>>
    %c3_122 = arith.constant 3 : index
    %c1_123 = arith.constant 1 : index
    %c2_124 = arith.constant 2 : index
    %211 = vector.load %arg4[%c3_122, %c1_123, %c2_124] : memref<4x18x18xf32, #tpu.memory_space<vmem>>, vector<1x16x16xf32>
    %212 = vector.shape_cast %211 : vector<1x16x16xf32> to vector<16x16xf32>
    %213 = vector.broadcast %210 : f32 to vector<16x16xf32>
    %214 = arith.mulf %213, %212 : vector<16x16xf32>
    %215 = arith.addf %209, %214 : vector<16x16xf32>
    %c33 = arith.constant 33 : index
    %216 = memref.load %arg2[%c33] : memref<36xf32, #tpu.memory_space<smem>>
    %c3_125 = arith.constant 3 : index
    %c2_126 = arith.constant 2 : index
    %c0_127 = arith.constant 0 : index
    %217 = vector.load %arg4[%c3_125, %c2_126, %c0_127] : memref<4x18x18xf32, #tpu.memory_space<vmem>>, vector<1x16x16xf32>
    %218 = vector.shape_cast %217 : vector<1x16x16xf32> to vector<16x16xf32>
    %219 = vector.broadcast %216 : f32 to vector<16x16xf32>
    %220 = arith.mulf %219, %218 : vector<16x16xf32>
    %221 = arith.addf %215, %220 : vector<16x16xf32>
    %c34 = arith.constant 34 : index
    %222 = memref.load %arg2[%c34] : memref<36xf32, #tpu.memory_space<smem>>
    %c3_128 = arith.constant 3 : index
    %c2_129 = arith.constant 2 : index
    %c1_130 = arith.constant 1 : index
    %223 = vector.load %arg4[%c3_128, %c2_129, %c1_130] : memref<4x18x18xf32, #tpu.memory_space<vmem>>, vector<1x16x16xf32>
    %224 = vector.shape_cast %223 : vector<1x16x16xf32> to vector<16x16xf32>
    %225 = vector.broadcast %222 : f32 to vector<16x16xf32>
    %226 = arith.mulf %225, %224 : vector<16x16xf32>
    %227 = arith.addf %221, %226 : vector<16x16xf32>
    %c35 = arith.constant 35 : index
    %228 = memref.load %arg2[%c35] : memref<36xf32, #tpu.memory_space<smem>>
    %c3_131 = arith.constant 3 : index
    %c2_132 = arith.constant 2 : index
    %c2_133 = arith.constant 2 : index
    %229 = vector.load %arg4[%c3_131, %c2_132, %c2_133] : memref<4x18x18xf32, #tpu.memory_space<vmem>>, vector<1x16x16xf32>
    %230 = vector.shape_cast %229 : vector<1x16x16xf32> to vector<16x16xf32>
    %231 = vector.broadcast %228 : f32 to vector<16x16xf32>
    %232 = arith.mulf %231, %230 : vector<16x16xf32>
    %233 = arith.addf %227, %232 : vector<16x16xf32>
    %c0_134 = arith.constant 0 : index
    %c3_135 = arith.constant 3 : index
    %c0_136 = arith.constant 0 : index
    %c0_137 = arith.constant 0 : index
    %234 = vector.load %arg3[%c0_134, %c3_135, %c0_136, %c0_137] : memref<1x4x16x16xf32, #tpu.memory_space<vmem>>, vector<1x1x16x16xf32>
    %235 = vector.shape_cast %234 : vector<1x1x16x16xf32> to vector<16x16xf32>
    %236 = vector.shape_cast %233 : vector<16x16xf32> to vector<1x1x16x16xf32>
    tpu.vector_store %arg3[%c0_134, %c3_135, %c0_136, %c0_137], %236 {strides = array<i32>} : memref<1x4x16x16xf32, #tpu.memory_space<vmem>>, vector<1x1x16x16xf32>,
    return
  }
  func.func @transform_0(%arg0: i32) -> (i32, i32, i32, i32) {
    %c0_i32 = arith.constant 0 : i32
    %c0_i32_0 = arith.constant 0 : i32
    %c0_i32_1 = arith.constant 0 : i32
    %c0_i32_2 = arith.constant 0 : i32
    return %arg0, %c0_i32, %c0_i32_0, %c0_i32_1 : i32, i32, i32, i32
  }
  func.func @transform_1(%arg0: i32) -> i32 {
    %c0_i32 = arith.constant 0 : i32
    %c0_i32_0 = arith.constant 0 : i32
    return %c0_i32 : i32
  }
  func.func @transform_2(%arg0: i32) -> (i32, i32, i32, i32) {
    %c0_i32 = arith.constant 0 : i32
    %c0_i32_0 = arith.constant 0 : i32
    %c0_i32_1 = arith.constant 0 : i32
    %c0_i32_2 = arith.constant 0 : i32
    return %arg0, %c0_i32, %c0_i32_0, %c0_i32_1 : i32, i32, i32, i32
  }
}

</mosaic_0001>

<bundles_post_ra>
// kernel: tpu_custom_call.1
= control target key start
LH: loop header
LB: loop body
LE: loop exit
PB: predicated region body
PF: predicated region fallthrough
CT: control target
= control target key end

     0   :  { %7 = vsyncpa [#allocation4], 0  ;;  %s1428_s0 = inlined_call_operand.hbm [shape: f32[2,4,16,16], index: 0, kind: input, shape index: {}]   ;;  %s1429_s1 = inlined_call_operand.hbm [shape: f32[36], index: 1, kind: input, shape index: {}]   ;;  %s1430_s2 = inlined_call_operand.hbm [shape: f32[2,4,16,16], index: 2, kind: output, shape index: {}]  }
   0x1   :  { %9 = vsyncpa [#allocation4 + $0x1], 0 }
   0x2   :  { %10 = vsyncpa [#allocation6], 0 }
   0x3   :  { %11 = vsyncpa [#allocation5], 0 }
   0x4   :  { %13 = vsyncpa [#allocation5 + $0x1], 0  ;;  %s1054_s9 = smov 0   ;;  %s1056_s10 = smov 0  }
   0x5   :  { %s1058_s11 = smov 0   ;;  %s1060_s12 = smov 0  }
   0x6 LB: > { %s1075_s13 = sadd.s32 4294967295, %s1028_s12   ;;  %s789_s14 = sadd.s32 4294967294, %s1028_s12   ;;  %s1028_s12 = sphi %s1060_s12, %s1441_s12   ;;  %s1024_s11 = sphi %s1058_s11, %s1440_s11   ;;  %s1020_s10 = sphi %s1056_s10, %s1439_s10   ;;  %s1016_s9 = sphi %s1054_s9, %s1438_s9  }
   0x7   : > { %s1079_s15 = sadd.s32 1, %s1028_s12   ;;  %s26_s16 = sadd.s32 1, %s1024_s11 }
   0x8   : > { %s23_s17 = ssub.s32 %s1028_s12, %s1079_s15  ;;  %p33_p0 = scmp.ne.s32.totalorder %s1024_s11, %s1020_s10 }
   0x9   : > { %p24_p1 = scmp.eq.s32.totalorder %s23_s17, 0  ;;  %p34_p2 = scmp.eq.s32.totalorder %s1028_s12, 0 }
   0xa   : > { %p39_p3 = scmp.ne.s32.totalorder %s1020_s10, %s1016_s9  ;;  %p40_p4 = scmp.eq.s32.totalorder %s1075_s13, 0 }
   0xb   : > { %s1091_s18 = scalar_select %p24_p1, %s1024_s11, %s26_s16  }
   0xc   : > { %p1093_p5 = por %p34_p2, %p33_p0  ;;  %p1099_p6 = por %p40_p4, %p39_p3 }
   0xd   : > { %p84_p7 = scmp.eq.s32.totalorder %s1075_s13, 1  ;;  %p90_p8 = scmp.eq.s32.totalorder %s789_s14, 1 }
   0xe   : > { %p790_p9 = scmp.ge.s32.totalorder %s1028_s12, 1  ;;  %p97_p10 = scmp.lt.s32.totalorder %s1028_s12, 3 }
   0xf   : > { %p1106_p11 = por %p84_p7, %p33_p0  ;;  %p1110_p12 = por %p90_p8, %p39_p3 }
  0x10   : > { %p1114_p13 = pnand %p790_p9, %p97_p10  ;;  %s109_s26 = sshll.u32 %s1429_s1, 4  ;;  %s110_s26 = int_to_ptr.hbm [resolvable:$true] %s109_s26 }
  0x11   : > { %p869_p2 = scmp.lt.s32.totalorder %s1028_s12, 2  ;;  %s120_s27 = sand.u32 1, %s1024_s11  }
  0x12   : > { %p856_p1 = pneg %p1114_p13  ;;  %s793_s29 = sshll.u32 %s120_s27, 6 }
  0x13   : > { %p1130_p3 = pnand %p869_p2, %p1093_p5  ;;  %s1030_s30 = smov [#allocation7]  }
  0x14   : > { %p857_p7 = pnand %p856_p1, %p40_p4  ;;  %s846_s3 = sshll.u32 %s1028_s12, 6 }
  0x15   : > { %s124_s4 = scalar_lea.vmem [#allocation3], %s793_s29  ;;  %s129_s8 = scalar_lea.hbm %s1428_s0, %s846_s3 }
  0x16   : > { %859 = dma.hbm_to_smem (!%p857_p7), %s110_s26, 16, %s1030_s30, [#allocation6]  }
  0x17   : > { %s132_s5 = sshll.u32 %s124_s4, 4  ;;  %s130_s14 = sshll.u32 %s129_s8, 4  ;;  %s133_s5 = int_to_ptr.vmem [resolvable:$true] %s132_s5  ;;  %s131_s14 = int_to_ptr.hbm [resolvable:$true] %s130_s14 }
  0x18   : > { %s121_s16 = scalar_lea.sflag [#allocation4], %s120_s27  ;;  %s928_s17 = sshra.s32 %s131_s14, 4  ;;  %s929_s17 = int_to_ptr.hbm [resolvable:$true] %s928_s17 }
  0x19   : > { %s930_s19 = scalar_lea.hbm %s929_s17, 64  ;;  %p932_p8 = pneg %p1130_p3 }
  0x1a   : > { %p931_p5 = scmp.ne.s32.totalorder %s929_s17, %s930_s19  ;;  %s935_s26 = scalar_lea.hbm %s1428_s0, 128 }
  0x1b   : > { %p936_p1 = scmp.lt.s32.totalorder %s929_s17, %s1428_s0  ;;  %p937_p2 = scmp.lt.s32.totalorder %s935_s26, %s930_s19 }
  0x1c   : > { %p933_p9 = pnand %p932_p8, %p931_p5 }
  0x1d   : > { %p938_p7 = por %p937_p2, %p936_p1 }
  0x1e   : > { %p934_p10 = pneg %p933_p9 }
  0x20   : > { %p939_p0 = pnand %p938_p7, %p934_p10 }
  0x22   : > { %942 = shalt.err (!%p939_p0)
}
  0x23   : > { %s1031_s27 = smov 128   ;;  %s1032_s3 = smov 8  }
  0x24   : > { %863 = dma.hbm_to_vmem [thread:$0]  (!%p1130_p3), %s131_s14, 1024, %s133_s5, %s121_s16, %s1031_s27, %s1031_s27, %s1032_s3  }
  0x25   : > { %144 = sbr.rel (%p1114_p13) target bundleno = 422 (0x1a6), region = 28  ;;  %s1151_s4 = sand.u32 (!%p1114_p13), 1, %s1020_s10  }
  0x26   : > { %s797_s6 = sshll.u32 (!%p1114_p13), %s1151_s4, 6  ;;  %s147_s7 = scalar_lea.sflag (!%p1114_p13), [#allocation4], %s1151_s4 }
  0x27   : > { %s150_s8 = scalar_lea.vmem (!%p1114_p13), [#allocation3], %s797_s6 }
  0x2a   : > { %1003 = dma.done.wait (%p1099_p6), %s147_s7, 1024  }
  0x2b   : > { %1005 = vsyncadd (%p1099_p6), %s147_s7, 4294966272 }
  0x2c   : > { %1007 = dma.done.wait (%p40_p4), [#allocation6], 16  }
  0x2d   : > { %1009 = vsyncadd (%p40_p4), [#allocation6], 4294967280 }
  0x2e   : > { %161 = sfence }
  0x2f   : > { %v192_v0 = vld [vmem:[%s150_s8] sm:$0xff]  ;;  %v194_v1 = vld [vmem:[%s150_s8 + $0x10] sm:$0xff]  ;;  %s1033_s23 = smov 1   ;;  %v193_v3 = vld [vmem:[%s150_s8 + $0x8] sm:$0xff]  ;;  %vm178_vm0 = vcmask 146432   ;;  %v1034_v8 = vmov 0.0  }
  0x30   : > { %208 = vrot.lane.b32.xlu0 %v192_v0, %s1033_s23  ;;  %212 = vrot.lane.b32.xlu1 %v194_v1, %s1033_s23  ;;  %v196_v2 = vld [vmem:[%s150_s8 + $0x20] sm:$0xff]  ;;  %v195_v4 = vld [vmem:[%s150_s8 + $0x18] sm:$0xff]  ;;  %179 = vst.msk [vmem:[#allocation2] sm:$0xff] %vm178_vm0, %v1034_v8  ;;  %vm181_vm1 = vcmask 140288   ;;  %s801_s20 = sld [smem:[#allocation7 + $0x2]]  ;;  %vm232_vm2 = vcmask 138248  }
  0x31   : > { %216 = vrot.lane.b32.xlu2 %v196_v2, %s1033_s23  ;;  %v197_v5 = vld [vmem:[%s150_s8 + $0x28] sm:$0xff]  ;;  %v198_v6 = vld [vmem:[%s150_s8 + $0x30] sm:$0xff]  ;;  %v199_v7 = vld [vmem:[%s150_s8 + $0x38] sm:$0xff]  ;;  %180 = vst.msk [vmem:[#allocation2 + $0x8] sm:$0xff] %vm178_vm0, %v1034_v8  ;;  %s800_s28 = sld [smem:[#allocation7 + $0x1]]  ;;  %s1035_s14 = smov 126  }
  0x32   : > { %183 = vst.msk [vmem:[#allocation2 + $0x18] sm:$0xff] %vm178_vm0, %v1034_v8  ;;  %s803_s5 = sld [smem:[#allocation7 + $0x4]]  ;;  %s1036_s16 = smov 127   ;;  %vm349_vm3 = vcmask 130048  }
  0x33   : > { %184 = vst.msk [vmem:[#allocation2 + $0x20] sm:$0xff] %vm178_vm0, %v1034_v8  ;;  %s1175_s17 = sld [smem:[#allocation7 + $0x7]] }
  0x34   : > { %186 = vst.msk [vmem:[#allocation2 + $0x30] sm:$0xff] %vm178_vm0, %v1034_v8  ;;  %s804_s19 = sld [smem:[#allocation7 + $0x5]] }
  0x35   : > { %187 = vst.msk [vmem:[#allocation2 + $0x38] sm:$0xff] %vm178_vm0, %v1034_v8  ;;  %s807_s24 = sld [smem:[#allocation7 + $0x8]] }
  0x36   : > { %189 = vst.msk [vmem:[#allocation2 + $0x48] sm:$0xff] %vm178_vm0, %v1034_v8  ;;  %v264_v11 = vstv %s801_s20  ;;  %s1199_s25 = sld [smem:[#allocation7 + $0xb]] }
  0x37   : > { %190 = vst.msk [vmem:[#allocation2 + $0x50] sm:$0xff] %vm178_vm0, %v1034_v8  ;;  %v250_v12 = vstv %s800_s28  ;;  %s809_s26 = sld [smem:[#allocation7 + $0xa]] }
  0x38   : > { %210 = vrot.lane.b32.xlu0 %v193_v3, %s1033_s23  ;;  %214 = vrot.lane.b32.xlu1 %v195_v4, %s1033_s23  ;;  %182 = vst.msk [vmem:[#allocation2 + $0x10] sm:$0x3] %vm181_vm1, %v1034_v8  ;;  %v286_v20 = vstv %s803_s5  ;;  %s812_s29 = sld [smem:[#allocation7 + $0xd]] }
  0x39   : > { %218 = vrot.lane.b32.xlu2 %v197_v5, %s1033_s23  ;;  %185 = vst.msk [vmem:[#allocation2 + $0x28] sm:$0x3] %vm181_vm1, %v1034_v8  ;;  %v322_v27 = vstv %s1175_s17  ;;  %s815_s30 = sld [smem:[#allocation7 + $0x10]] }
  0x3a   : > { %188 = vst.msk [vmem:[#allocation2 + $0x40] sm:$0x3] %vm181_vm1, %v1034_v8  ;;  %v300_v28 = vstv %s804_s19  ;;  %s813_s27 = sld [smem:[#allocation7 + $0xe]] }
  0x3b   : > { %191 = vst.msk [vmem:[#allocation2 + $0x58] sm:$0x3] %vm181_vm1, %v1034_v8  ;;  %v336_v34 = vstv %s807_s24  ;;  %s816_s3 = sld [smem:[#allocation7 + $0x11]] }
  0x3c   : > { %v376_v39 = vstv %s1199_s25  ;;  %s821_s7 = sld [smem:[#allocation7 + $0x14]] }
  0x3d   : > { %v362_v40 = vstv %s809_s26  ;;  %s820_s8 = sld [smem:[#allocation7 + $0x13]] }
  0x3e   : > { %v398_v47 = vstv %s812_s29  ;;  %s832_s20 = sld [smem:[#allocation7 + $0x1d]] }
  0x3f   : > { %v434_v54 = vstv %s815_s30  ;;  %s831_s28 = sld [smem:[#allocation7 + $0x1c]] }
  0x40   : > { %220 = vrot.lane.b32.xlu0 %v198_v6, %s1033_s23  ;;  %222 = vrot.lane.b32.xlu1 %v199_v7, %s1033_s23  ;;  %v412_v55 = vstv %s813_s27  ;;  %s823_s23 = sld [smem:[#allocation7 + $0x16]] }
  0x41   : > { %v448_v60 = vstv %s816_s3  ;;  %s834_s5 = sld [smem:[#allocation7 + $0x1f]] }
  0x42   : > { %v488_v1 = vstv %s821_s7  ;;  %s835_s17 = sld [smem:[#allocation7 + $0x20]] }
  0x43   : > { %v474_v2 = vstv %s820_s8  ;;  %s824_s19 = sld [smem:[#allocation7 + $0x17]] }
  0x44   : > { %s826_s24 = sld [smem:[#allocation7 + $0x19]] }
  0x45   : > { %s1295_s25 = sld [smem:[#allocation7]] }
  0x46   : > { %v510_v8 = vstv %s823_s23  ;;  %s1299_s26 = sld [smem:[#allocation7 + $0x1a]] }
  0x47   : > { %s1301_s29 = sld [smem:[#allocation7 + $0x22]] }
  0x48   : > { %s1308_s30 = sld [smem:[#allocation7 + $0x3]] }
  0x49   : > { %s1314_s27 = sld [smem:[#allocation7 + $0x23]] }
  0x4a   : > { %s805_s3 = sld [smem:[#allocation7 + $0x6]] }
  0x4b   : > { %s1343_s7 = sld [smem:[#allocation7 + $0xc]] }
  0x4c   : > { %s814_s8 = sld [smem:[#allocation7 + $0xf]] }
  0x4d   : > { %s1360_s23 = sld [smem:[#allocation7 + $0x15]] }
  0x8b   : > { %v217_v24 = vpop.permute.xlu2 %216 }
  0x8c   : > { %237 = vst.msk [vmem:[#allocation2 + $0x31] sm:$0xff] %vm232_vm2, %v217_v24  ;;  %v622_v24 = vstv %s834_s5  ;;  %s1373_s5 = sld [smem:[#allocation7 + $0x18]] }
  0x93   : > { %v219_v32 = vpop.permute.xlu2 %218  ;;  %v1249_v0 = vld [vmem:[#allocation2 + $0x30] sm:$0xff] }
  0x94   : > { %238 = vst.msk [vmem:[#allocation2 + $0x39] sm:$0xff] %vm232_vm2, %v219_v32  ;;  %v489_v3 = vmul.f32 %v488_v1, %v1249_v0  ;;  %v475_v4 = vmul.f32 %v474_v2, %v1249_v0  ;;  %v636_v32 = vstv %s835_s17  ;;  %s836_s17 = sld [smem:[#allocation7 + $0x21]] }
  0x9b   : > { %v1257_v6 = vld [vmem:[#allocation2 + $0x39] sm:$0xff] }
  0x9c   : > { %v1259_v7 = vld [vmem:[#allocation2 + $0x38] sm:$0xff] }
  0xa2   : > { %v209_v9 = vpop.permute.xlu0 %208  ;;  %v213_v10 = vpop.permute.xlu1 %212 }
  0xa3   : > { %233 = vst.msk [vmem:[#allocation2 + $0x1] sm:$0xff] %vm232_vm2, %v209_v9  ;;  %v512_v9 = vmul.f32 %v510_v8, %v1257_v6 }
  0xa4   : > { %235 = vst.msk [vmem:[#allocation2 + $0x19] sm:$0xff] %vm232_vm2, %v213_v10  ;;  %v476_v10 = vmul.f32 %v474_v2, %v1259_v7 }
  0xaa   : > { %v211_v13 = vpop.permute.xlu0 %210  ;;  %v1167_v14 = vld [vmem:[#allocation2] sm:$0xff]  ;;  %v215_v15 = vpop.permute.xlu1 %214 }
  0xab   : > { %234 = vst.msk [vmem:[#allocation2 + $0x9] sm:$0xff] %vm232_vm2, %v211_v13  ;;  %v265_v16 = vmul.f32 %v264_v11, %v1167_v14  ;;  %v251_v17 = vmul.f32 %v250_v12, %v1167_v14  ;;  %v1188_v25 = vld [vmem:[#allocation2 + $0x1] sm:$0xff]  ;;  %v1210_v38 = vld [vmem:[#allocation2 + $0x18] sm:$0xff]  ;;  %v600_v13 = vstv %s832_s20  ;;  %s830_s20 = sld [smem:[#allocation7 + $0x1b]] }
  0xac   : > { %236 = vst.msk [vmem:[#allocation2 + $0x21] sm:$0xff] %vm232_vm2, %v215_v15  ;;  %v287_v29 = vmul.f32 %v286_v20, %v1188_v25  ;;  %v301_v31 = vmul.f32 %v300_v28, %v1188_v25  ;;  %v377_v41 = vmul.f32 %v376_v39, %v1210_v38  ;;  %v363_v42 = vmul.f32 %v362_v40, %v1210_v38  ;;  %v1231_v52 = vld [vmem:[#allocation2 + $0x19] sm:$0xff] }
  0xad   : > { %269 = vrot.lane.b32.xlu1 %v265_v16, %s1035_s14  ;;  %255 = vrot.lane.b32.xlu2 %v251_v17, %s1036_s16  ;;  %v399_v56 = vmul.f32 %v398_v47, %v1231_v52  ;;  %v413_v58 = vmul.f32 %v412_v55, %v1231_v52  ;;  %v586_v15 = vstv %s831_s28  ;;  %v1269_v16 = vld [vmem:[#allocation2 + $0x31] sm:$0xff]  ;;  %s1370_s28 = sld [smem:[#allocation7 + $0x1e]] }
  0xb2   : > { %v1177_v18 = vld [vmem:[#allocation2 + $0x8] sm:$0xff]  ;;  %v221_v45 = vpop.permute.xlu0 %220  ;;  %v223_v51 = vpop.permute.xlu1 %222 }
  0xb3   : > { %v1179_v19 = vld [vmem:[#allocation2 + $0x9] sm:$0xff]  ;;  %v252_v21 = vmul.f32 %v250_v12, %v1177_v18  ;;  %v266_v23 = vmul.f32 %v264_v11, %v1177_v18  ;;  %v1219_v44 = vld [vmem:[#allocation2 + $0x21] sm:$0xff]  ;;  %239 = vst.msk [vmem:[#allocation2 + $0x49] sm:$0xff] %vm232_vm2, %v221_v45  ;;  %v490_v11 = vmul.f32 %v488_v1, %v1259_v7 }
  0xb4   : > { %v288_v22 = vmul.f32 %v286_v20, %v1179_v19  ;;  %v1190_v26 = vld [vmem:[#allocation2 + $0x2] sm:$0xff]  ;;  %v1202_v33 = vld [vmem:[#allocation2 + $0xa] sm:$0xff]  ;;  %v302_v35 = vmul.f32 %v300_v28, %v1179_v19  ;;  %v400_v48 = vmul.f32 %v398_v47, %v1219_v44  ;;  %240 = vst.msk [vmem:[#allocation2 + $0x51] sm:$0xff] %vm232_vm2, %v223_v51  ;;  %v1233_v53 = vld [vmem:[#allocation2 + $0x1a] sm:$0xff]  ;;  %v414_v61 = vmul.f32 %v412_v55, %v1219_v44 }
  0xb5   : > { %257 = vrot.lane.b32.xlu0 %v252_v21, %s1036_s16  ;;  %271 = vrot.lane.b32.xlu2 %v266_v23, %s1035_s14  ;;  %v323_v30 = vmul.f32 %v322_v27, %v1190_v26  ;;  %v338_v36 = vmul.f32 %v336_v34, %v1202_v33  ;;  %v324_v37 = vmul.f32 %v322_v27, %v1202_v33  ;;  %v1222_v46 = vld [vmem:[#allocation2 + $0x20] sm:$0xff] }
  0xb6   : > { %293 = vrot.lane.b32.xlu1 %v288_v22, %s1036_s16  ;;  %v337_v43 = vmul.f32 %v336_v34, %v1190_v26  ;;  %v364_v49 = vmul.f32 %v362_v40, %v1222_v46  ;;  %v378_v50 = vmul.f32 %v376_v39, %v1222_v46  ;;  %v435_v57 = vmul.f32 %v434_v54, %v1233_v53  ;;  %v1241_v59 = vld [vmem:[#allocation2 + $0x22] sm:$0xff]  ;;  %v1297_v40 = vld [vmem:[#allocation2 + $0x3a] sm:$0xff] }
  0xb7   : > { %v450_v62 = vmul.f32 %v448_v60, %v1241_v59  ;;  %v436_v63 = vmul.f32 %v434_v54, %v1241_v59  ;;  %v449_v5 = vmul.f32 %v448_v60, %v1233_v53  ;;  %v511_v21 = vmul.f32 %v510_v8, %v1269_v16 }
  0xb8   : > { %v524_v34 = vstv %s824_s19  ;;  %v658_v54 = vstv %s1301_s29  ;;  %v280_v60 = vstv %s1308_s30  ;;  %s847_s19 = sshll.u32 %s1075_s13, 6  ;;  %s689_s13 = scalar_lea.sflag [#allocation5], %s1151_s4 }
  0xba   : > { %v1267_v12 = vld [vmem:[#allocation2 + $0x48] sm:$0xff] }
  0xbb   : > { %v601_v17 = vmul.f32 %v600_v13, %v1267_v12  ;;  %v587_v20 = vmul.f32 %v586_v15, %v1267_v12  ;;  %v1277_v22 = vld [vmem:[#allocation2 + $0x50] sm:$0xff] }
  0xbc   : > { %v1279_v23 = vld [vmem:[#allocation2 + $0x51] sm:$0xff]  ;;  %v588_v27 = vmul.f32 %v586_v15, %v1277_v22 }
  0xbd   : > { %291 = vrot.lane.b32.xlu0 %v287_v29, %s1036_s16  ;;  %305 = vrot.lane.b32.xlu2 %v301_v31, %s1035_s14  ;;  %v624_v28 = vmul.f32 %v622_v24, %v1279_v23  ;;  %v602_v29 = vmul.f32 %v600_v13, %v1277_v22  ;;  %v1287_v31 = vld [vmem:[#allocation2 + $0x49] sm:$0xff]  ;;  %v638_v45 = vmul.f32 %v636_v32, %v1279_v23  ;;  %v1328_v2 = vld [vmem:[#allocation2 + $0x52] sm:$0xff] }
  0xbe   : > { %327 = vrot.lane.b32.xlu1 %v323_v30, %s1036_s16  ;;  %v1317_v51 = vld [vmem:[#allocation2 + $0x4a] sm:$0xff] }
  0xc5   : > { %307 = vrot.lane.b32.xlu0 %v302_v35, %s1035_s14  ;;  %329 = vrot.lane.b32.xlu2 %v324_v37, %s1036_s16  ;;  %v623_v35 = vmul.f32 %v622_v24, %v1287_v31  ;;  %v525_v37 = vmul.f32 %v524_v34, %v1269_v16 }
  0xc6   : > { %343 = vrot.lane.b32.xlu1 %v338_v36, %s1035_s14  ;;  %v637_v36 = vmul.f32 %v636_v32, %v1287_v31 }
  0xcd   : > { %341 = vrot.lane.b32.xlu0 %v337_v43, %s1035_s14  ;;  %367 = vrot.lane.b32.xlu2 %v363_v42, %s1036_s16  ;;  %v526_v42 = vmul.f32 %v524_v34, %v1257_v6 }
  0xce   : > { %381 = vrot.lane.b32.xlu1 %v377_v41, %s1035_s14  ;;  %v546_v41 = vstv %s826_s24 }
  0xcf   : > { %v548_v43 = vmul.f32 %v546_v41, %v1297_v40 }
  0xd5   : > { %369 = vrot.lane.b32.xlu0 %v364_v49, %s1036_s16  ;;  %383 = vrot.lane.b32.xlu2 %v378_v50, %s1035_s14  ;;  %v560_v49 = vstv %s1299_s26  ;;  %v244_v50 = vstv %s1295_s25  ;;  %s700_s26 = scalar_lea.hbm %s1430_s2, %s847_s19 }
  0xd6   : > { %405 = vrot.lane.b32.xlu1 %v400_v48, %s1036_s16  ;;  %v1311_v48 = vld [vmem:[#allocation2 + $0x32] sm:$0xff]  ;;  %s703_s30 = sshll.u32 %s700_s26, 4  ;;  %s704_s30 = int_to_ptr.hbm [resolvable:$true] %s703_s30 }
  0xd7   : > { %v547_v55 = vmul.f32 %v546_v41, %v1311_v48 }
  0xdd   : > { %403 = vrot.lane.b32.xlu0 %v399_v56, %s1036_s16  ;;  %417 = vrot.lane.b32.xlu2 %v413_v58, %s1035_s14  ;;  %v561_v56 = vmul.f32 %v560_v49, %v1311_v48  ;;  %v659_v58 = vmul.f32 %v658_v54, %v1317_v51 }
  0xde   : > { %439 = vrot.lane.b32.xlu1 %v435_v57, %s1036_s16  ;;  %v245_v57 = vmul.f32 %v244_v50, %v1167_v14  ;;  %v660_v14 = vmul.f32 %v658_v54, %v1328_v2 }
  0xe5   : > { %419 = vrot.lane.b32.xlu0 %v414_v61, %s1035_s14  ;;  %441 = vrot.lane.b32.xlu2 %v436_v63, %s1036_s16 }
  0xe6   : > { %455 = vrot.lane.b32.xlu1 %v450_v62, %s1035_s14 }
  0xed   : > { %453 = vrot.lane.b32.xlu0 %v449_v5, %s1035_s14  ;;  %479 = vrot.lane.b32.xlu2 %v475_v4, %s1036_s16  ;;  %v281_v4 = vmul.f32 %v280_v60, %v1188_v25 }
  0xee   : > { %493 = vrot.lane.b32.xlu1 %v489_v3, %s1035_s14  ;;  %v672_v3 = vstv %s1314_s27  ;;  %s972_s27 = sshra.s32 %s704_s30, 4  ;;  %s973_s27 = int_to_ptr.hbm [resolvable:$true] %s972_s27 }
  0xef   : > { %v674_v8 = vmul.f32 %v672_v3, %v1328_v2  ;;  %p979_p0 = scmp.lt.s32.totalorder %s973_s27, %s1430_s2 }
  0xf5   : > { %481 = vrot.lane.b32.xlu0 %v476_v10, %s1036_s16  ;;  %495 = vrot.lane.b32.xlu2 %v490_v11, %s1035_s14  ;;  %v246_v10 = vmul.f32 %v244_v50, %v1177_v18 }
  0xf6   : > { %517 = vrot.lane.b32.xlu1 %v512_v9, %s1036_s16  ;;  %v562_v9 = vmul.f32 %v560_v49, %v1297_v40 }
  0xfd   : > { %515 = vrot.lane.b32.xlu0 %v511_v21, %s1036_s16  ;;  %591 = vrot.lane.b32.xlu2 %v587_v20, %s1036_s16  ;;  %v282_v20 = vmul.f32 %v280_v60, %v1179_v19  ;;  %v673_v21 = vmul.f32 %v672_v3, %v1317_v51 }
  0xfe   : > { %605 = vrot.lane.b32.xlu1 %v601_v17, %s1035_s14 }
 0x105   : > { %593 = vrot.lane.b32.xlu0 %v588_v27, %s1036_s16  ;;  %607 = vrot.lane.b32.xlu2 %v602_v29, %s1035_s14 }
 0x106   : > { %629 = vrot.lane.b32.xlu1 %v624_v28, %s1036_s16  ;;  %v316_v28 = vstv %s805_s3  ;;  %s974_s3 = scalar_lea.hbm %s973_s27, 64 }
 0x107   : > { %v256_v30 = vpop.permute.xlu2 %255  ;;  %v317_v34 = vmul.f32 %v316_v28, %v1190_v26  ;;  %p975_p4 = scmp.ne.s32.totalorder %s973_s27, %s974_s3 }
 0x108   : > { %v261_v61 = vadd.f32 %v256_v30, %v245_v57 }
 0x109   : > { %p976_p6 = pnand %p975_p4, %p1106_p11 }
 0x10b   : > { %p977_p13 = pneg %p976_p6 }
 0x10d   : > { %627 = vrot.lane.b32.xlu0 %v623_v35, %s1036_s16  ;;  %529 = vrot.lane.b32.xlu2 %v525_v37, %s1035_s14 }
 0x10e   : > { %641 = vrot.lane.b32.xlu1 %v637_v36, %s1035_s14 }
 0x10f   : > { %v272_v39 = vpop.permute.xlu2 %271 }
 0x115   : > { %531 = vrot.lane.b32.xlu0 %v526_v42, %s1035_s14  ;;  %643 = vrot.lane.b32.xlu2 %v638_v45, %s1035_s14 }
 0x116   : > { %553 = vrot.lane.b32.xlu1 %v548_v43, %s1036_s16 }
 0x117   : > { %v306_v47 = vpop.permute.xlu2 %305 }
 0x11d   : > { %551 = vrot.lane.b32.xlu0 %v547_v55, %s1036_s16  ;;  %663 = vrot.lane.b32.xlu2 %v659_v58, %s1036_s16 }
 0x11e   : > { %565 = vrot.lane.b32.xlu1 %v561_v56, %s1035_s14 }
 0x11f   : > { %v270_v62 = vpop.permute.xlu1 %269  ;;  %v330_v1 = vpop.permute.xlu2 %329 }
 0x120   : > { %v275_v63 = vadd.f32 %v270_v62, %v261_v61 }
 0x122   : > { %v283_v5 = vadd.f32 %v281_v4, %v275_v63 }
 0x125   : > { %665 = vrot.lane.b32.xlu0 %v660_v14, %s1036_s16  ;;  %567 = vrot.lane.b32.xlu2 %v562_v9, %s1035_s14  ;;  %s808_s16 = sld [smem:[#allocation7 + $0x9]] }
 0x126   : > { %679 = vrot.lane.b32.xlu1 %v674_v8, %s1035_s14 }
 0x127   : > { %v258_v11 = vpop.permute.xlu0 %257  ;;  %v368_v25 = vpop.permute.xlu2 %367 }
 0x128   : > { %v294_v13 = vpop.permute.xlu1 %293  ;;  %v262_v15 = vadd.f32 %v258_v11, %v246_v10  ;;  %v428_v10 = vstv %s814_s8  ;;  %s978_s8 = scalar_lea.hbm %s1430_s2, 128 }
 0x129   : > { %p980_p3 = scmp.lt.s32.totalorder %s978_s8, %s974_s3 }
 0x12a   : > { %v276_v17 = vadd.f32 %v272_v39, %v262_v15  ;;  %v318_v39 = vmul.f32 %v316_v28, %v1202_v33 }
 0x12b   : > { %v356_v43 = vstv %s808_s16  ;;  %p981_p5 = por %p980_p3, %p979_p0 }
 0x12c   : > { %v284_v24 = vadd.f32 %v282_v20, %v276_v17  ;;  %v357_v49 = vmul.f32 %v356_v43, %v1210_v38  ;;  %v358_v62 = vmul.f32 %v356_v43, %v1222_v46 }
 0x12d   : > { %677 = vrot.lane.b32.xlu0 %v673_v21, %s1035_s14  ;;  %s1350_s14 = scalar_lea.vmem [#allocation8], %s797_s6  ;;  %s819_s6 = sld [smem:[#allocation7 + $0x12]] }
 0x12e   : > { %v298_v36 = vadd.f32 %v294_v13, %v284_v24  ;;  %v373_v26 = vadd.f32 %v368_v25, %v357_v49  ;;  %v429_v25 = vmul.f32 %v428_v10, %v1233_v53  ;;  %s701_s29 = sshll.u32 %s1350_s14, 4  ;;  %p982_p8 = pnand %p981_p5, %p977_p13  ;;  %s702_s29 = int_to_ptr.vmem [resolvable:$true] %s701_s29 }
 0x12f   : > { %v292_v27 = vpop.permute.xlu0 %291  ;;  %v384_v32 = vpop.permute.xlu2 %383 }
 0x130   : > { %v328_v29 = vpop.permute.xlu1 %327  ;;  %v297_v30 = vadd.f32 %v292_v27, %v283_v5 }
 0x132   : > { %v311_v18 = vadd.f32 %v306_v47, %v297_v30  ;;  %v392_v47 = vstv %s1343_s7 }
 0x133   : > { %v393_v38 = vmul.f32 %v392_v47, %v1231_v52  ;;  %v394_v14 = vmul.f32 %v392_v47, %v1219_v44  ;;  %v430_v44 = vmul.f32 %v428_v10, %v1241_v59  ;;  %v468_v27 = vstv %s819_s6 }
 0x134   : > { %v319_v35 = vadd.f32 %v317_v34, %v311_v18  ;;  %v469_v30 = vmul.f32 %v468_v27, %v1249_v0  ;;  %v504_v18 = vstv %s1360_s23  ;;  %v470_v0 = vmul.f32 %v468_v27, %v1259_v7 }
 0x135   : > { %v505_v59 = vmul.f32 %v504_v18, %v1269_v16  ;;  %v506_v16 = vmul.f32 %v504_v18, %v1257_v6 }
 0x136   : > { %v333_v54 = vadd.f32 %v328_v29, %v319_v35 }
 0x137   : > { %v308_v19 = vpop.permute.xlu0 %307  ;;  %v418_v42 = vpop.permute.xlu2 %417 }
 0x138   : > { %v344_v37 = vpop.permute.xlu1 %343  ;;  %v312_v41 = vadd.f32 %v308_v19, %v298_v36 }
 0x13a   : > { %v320_v45 = vadd.f32 %v318_v39, %v312_v41 }
 0x13c   : > { %v334_v50 = vadd.f32 %v330_v1, %v320_v45 }
 0x13e   : > { %v348_v55 = vadd.f32 %v344_v37, %v334_v50  ;;  %v580_v50 = vstv %s830_s20 }
 0x13f   : > { %v342_v56 = vpop.permute.xlu0 %341  ;;  %v442_v60 = vpop.permute.xlu2 %441  ;;  %v582_v6 = vmul.f32 %v580_v50, %v1277_v22 }
 0x140   : > { %v382_v57 = vpop.permute.xlu1 %381  ;;  %351 = vst.msk [vmem:[%s1350_s14 + $0x8] sm:$0xff] %vm349_vm3, %v348_v55  ;;  %v347_v33 = vadd.f32 %v342_v56, %v333_v54  ;;  %v616_v55 = vstv %s1370_s28 }
 0x141   : > { %v387_v58 = vadd.f32 %v382_v57, %v373_v26  ;;  %v581_v26 = vmul.f32 %v580_v50, %v1267_v12 }
 0x142   : > { %350 = vst.msk [vmem:[%s1350_s14] sm:$0xff] %vm349_vm3, %v347_v33 }
 0x143   : > { %v395_v61 = vadd.f32 %v393_v38, %v387_v58 }
 0x147   : > { %v370_v63 = vpop.permute.xlu0 %369  ;;  %v480_v4 = vpop.permute.xlu2 %479 }
 0x148   : > { %v406_v1 = vpop.permute.xlu1 %405  ;;  %v374_v3 = vadd.f32 %v370_v63, %v358_v62  ;;  %v485_v53 = vadd.f32 %v480_v4, %v469_v30 }
 0x14a   : > { %v388_v5 = vadd.f32 %v384_v32, %v374_v3 }
 0x14c   : > { %v396_v8 = vadd.f32 %v394_v14, %v388_v5 }
 0x14e   : > { %v410_v46 = vadd.f32 %v406_v1, %v396_v8 }
 0x14f   : > { %v404_v9 = vpop.permute.xlu0 %403  ;;  %v496_v15 = vpop.permute.xlu2 %495 }
 0x150   : > { %v440_v11 = vpop.permute.xlu1 %439  ;;  %v409_v13 = vadd.f32 %v404_v9, %v395_v61  ;;  %v617_v61 = vmul.f32 %v616_v55, %v1287_v31  ;;  %v618_v9 = vmul.f32 %v616_v55, %v1279_v23 }
 0x152   : > { %v423_v52 = vadd.f32 %v418_v42, %v409_v13 }
 0x154   : > { %v431_v17 = vadd.f32 %v429_v25, %v423_v52 }
 0x156   : > { %v445_v34 = vadd.f32 %v440_v11, %v431_v17  ;;  %v652_v11 = vstv %s836_s17 }
 0x157   : > { %v420_v20 = vpop.permute.xlu0 %419  ;;  %v592_v29 = vpop.permute.xlu2 %591  ;;  %v653_v17 = vmul.f32 %v652_v11, %v1317_v51 }
 0x158   : > { %v456_v21 = vpop.permute.xlu1 %455  ;;  %v424_v24 = vadd.f32 %v420_v20, %v410_v46  ;;  %v597_v56 = vadd.f32 %v592_v29, %v581_v26 }
 0x15a   : > { %v432_v28 = vadd.f32 %v430_v44, %v424_v24 }
 0x15c   : > { %v446_v32 = vadd.f32 %v442_v60, %v432_v28  ;;  %v540_v60 = vstv %s1373_s5 }
 0x15d   : > { %v541_v1 = vmul.f32 %v540_v60, %v1311_v48  ;;  %v654_v48 = vmul.f32 %v652_v11, %v1328_v2  ;;  %v542_v28 = vmul.f32 %v540_v60, %v1297_v40 }
 0x15e   : > { %v460_v35 = vadd.f32 %v456_v21, %v446_v32 }
 0x15f   : > { %v454_v36 = vpop.permute.xlu0 %453  ;;  %v608_v42 = vpop.permute.xlu2 %607 }
 0x160   : > { %v494_v19 = vpop.permute.xlu1 %493  ;;  %818 = vst.msk [vmem:[%s1350_s14 + $0x18] sm:$0xff] %vm349_vm3, %v460_v35  ;;  %v459_v37 = vadd.f32 %v454_v36, %v445_v34 }
 0x161   : > { %v499_v39 = vadd.f32 %v494_v19, %v485_v53 }
 0x162   : > { %817 = vst.msk [vmem:[%s1350_s14 + $0x10] sm:$0xff] %vm349_vm3, %v459_v37 }
 0x163   : > { %v507_v41 = vadd.f32 %v505_v59, %v499_v39 }
 0x167   : > { %v482_v43 = vpop.permute.xlu0 %481  ;;  %v530_v57 = vpop.permute.xlu2 %529 }
 0x168   : > { %v518_v45 = vpop.permute.xlu1 %517  ;;  %v486_v49 = vadd.f32 %v482_v43, %v470_v0 }
 0x16a   : > { %v500_v47 = vadd.f32 %v496_v15, %v486_v49 }
 0x16c   : > { %v508_v54 = vadd.f32 %v506_v16, %v500_v47 }
 0x16e   : > { %v522_v44 = vadd.f32 %v518_v45, %v508_v54 }
 0x16f   : > { %v516_v33 = vpop.permute.xlu0 %515  ;;  %v644_v14 = vpop.permute.xlu2 %643 }
 0x170   : > { %v606_v58 = vpop.permute.xlu1 %605  ;;  %v521_v7 = vadd.f32 %v516_v33, %v507_v41 }
 0x171   : > { %v611_v38 = vadd.f32 %v606_v58, %v597_v56 }
 0x172   : > { %v535_v62 = vadd.f32 %v530_v57, %v521_v7 }
 0x173   : > { %v619_v63 = vadd.f32 %v617_v61, %v611_v38 }
 0x174   : > { %v543_v3 = vadd.f32 %v541_v1, %v535_v62 }
 0x177   : > { %v594_v12 = vpop.permute.xlu0 %593  ;;  %v664_v20 = vpop.permute.xlu2 %663 }
 0x178   : > { %v630_v4 = vpop.permute.xlu1 %629  ;;  %v598_v5 = vadd.f32 %v594_v12, %v582_v6 }
 0x17a   : > { %v612_v8 = vadd.f32 %v608_v42, %v598_v5 }
 0x17c   : > { %v620_v10 = vadd.f32 %v618_v9, %v612_v8 }
 0x17e   : > { %v634_v13 = vadd.f32 %v630_v4, %v620_v10 }
 0x17f   : > { %v628_v15 = vpop.permute.xlu0 %627  ;;  %v568_v2 = vpop.permute.xlu2 %567 }
 0x180   : > { %v642_v31 = vpop.permute.xlu1 %641  ;;  %v648_v52 = vadd.f32 %v644_v14, %v634_v13  ;;  %v633_v25 = vadd.f32 %v628_v15, %v619_v63 }
 0x182   : > { %v647_v22 = vadd.f32 %v642_v31, %v633_v25  ;;  %v656_v46 = vadd.f32 %v654_v48, %v648_v52 }
 0x184   : > { %v655_v21 = vadd.f32 %v653_v17, %v647_v22 }
 0x186   : > { %v669_v37 = vadd.f32 %v664_v20, %v655_v21 }
 0x187   : > { %v532_v23 = vpop.permute.xlu0 %531 }
 0x188   : > { %v554_v24 = vpop.permute.xlu1 %553  ;;  %v536_v27 = vadd.f32 %v532_v23, %v522_v44 }
 0x18a   : > { %v544_v29 = vadd.f32 %v542_v28, %v536_v27 }
 0x18c   : > { %v558_v30 = vadd.f32 %v554_v24, %v544_v29 }
 0x18e   : > { %v572_v32 = vadd.f32 %v568_v2, %v558_v30 }
 0x18f   : > { %v552_v51 = vpop.permute.xlu0 %551 }
 0x190   : > { %v566_v18 = vpop.permute.xlu1 %565  ;;  %829 = vst.msk [vmem:[%s1350_s14 + $0x28] sm:$0xff] %vm349_vm3, %v572_v32  ;;  %v557_v53 = vadd.f32 %v552_v51, %v543_v3 }
 0x192   : > { %v571_v34 = vadd.f32 %v566_v18, %v557_v53 }
 0x194   : > { %828 = vst.msk [vmem:[%s1350_s14 + $0x20] sm:$0xff] %vm349_vm3, %v571_v34 }
 0x197   : > { %v666_v35 = vpop.permute.xlu0 %665 }
 0x198   : > { %v670_v36 = vadd.f32 %v666_v35, %v656_v46  ;;  %v680_v40 = vpop.permute.xlu1 %679 }
 0x19a   : > { %v684_v19 = vadd.f32 %v680_v40, %v670_v36 }
 0x19c   : > { %840 = vst.msk [vmem:[%s1350_s14 + $0x38] sm:$0xff] %vm349_vm3, %v684_v19 }
 0x19f   : > { %v678_v39 = vpop.permute.xlu0 %677 }
 0x1a0   : > { %v683_v59 = vadd.f32 %v678_v39, %v669_v37 }
 0x1a2   : > { %839 = vst.msk [vmem:[%s1350_s14 + $0x30] sm:$0xff] %vm349_vm3, %v683_v59 }
 0x1a3   : > { %985 = shalt.err (!%p982_p8)
}
 0x1a4   : > { %s1037_s4 = smov 128   ;;  %s1038_s14 = smov 8  }
 0x1a5   : > { %854 = dma.vmem_to_hbm [thread:$0]  (%p1106_p11), %s702_s29, 1024, %s704_s30, %s689_s13, %s1037_s4, %s1037_s4, %s1038_s14  }
 0x1a6 PF: > { %s718_s20 = sand.u32 1, %s1016_s9   ;;  %p1437_p9 = scmp.ge.s32.totalorder %s1028_s12, 2 }
 0x1a7   : > { %s719_s28 = scalar_lea.sflag [#allocation5], %s718_s20 }
 0x1a8   : > { %p865_p10 = pnand %p1437_p9, %p1110_p12 }
 0x1aa   : > { %p866_p1 = pneg %p865_p10 }
 0x1ac   : > { %1011 = dma.done.wait (%p866_p1), %s719_s28, 1024  }
 0x1ad   : > { %1013 = vsyncadd (%p866_p1), %s719_s28, 4294966272  ;;  %p16_p2 = scmp.ge.s32.totalorder %s1079_s15, 4   ;;  %s1438_s9 = smov %s1020_s10 }
 0x1ae   : > { %s1439_s10 = smov %s1024_s11  ;;  %s1440_s11 = smov %s1091_s18 }
 0x1af   : > { %s1441_s12 = smov %s1079_s15  ;;  %18 = sbr.rel (!%p16_p2) target bundleno = 6 (0x6), region = 84 }
 0x1b4   :  { %725 = vsyncpa [#allocation4], 1 }
 0x1b5   :  { %727 = vsyncpa [#allocation4 + $0x1], 1 }
 0x1b6   :  { %728 = vsyncpa [#allocation5], 1 }
 0x1b7   :  { %730 = vsyncpa [#allocation5 + $0x1], 1 }
 0x1b8   :  { %731 = vsyncpa [#allocation6], 1 }
 0x1b9   :  { %733 = vsyncpa [#allocation6 + $0x1], 1 }

</bundles_post_ra>
